<compile_context>
chip_gen: v5e
topology: v5e:2x2
jax: 0.10.0
libtpu: 0.0.40
codegen_flags: <defaults>
</compile_context>

<pallas_src>
import jax
import jax.numpy as jnp
from jax.experimental import pallas as pl
from jax.experimental.pallas import tpu as pltpu

_LANES = 128
# Max sublane-rows per block: 4096 rows * 128 lanes * 4 B = 2 MiB output slab,
# ~6 MiB input slab (N=2) -> ~12 MiB double-buffered footprint, safe on
# v5e/v6e/v7x while being large enough to amortize per-step overhead.
_MAX_ROWS_PER_BLOCK = 4096


def _round_up(x: int, m: int) -> int:
    return ((x + m - 1) // m) * m


def _or_max_kernel(x_ref, o_ref):
    # x_ref: (N, TS, 128) input tile (batch block dim squeezed out)
    # o_ref: (TS, 128)    output tile
    acc = x_ref[0]
    for n in range(1, x_ref.shape[0]):  # static fold over N (N = 2 here)
        acc = jnp.maximum(acc, x_ref[n])
    o_ref[...] = acc


def or_forward(attention: jax.Array) -> jax.Array:
    """torch.max(attention, dim=1)[0] for a [B, N, H, W] tensor -> [B, H, W]."""
    B, N, H, W = attention.shape
    HW = H * W

    # --- wrapper-side lane-dense retile: (B, N, H, W) -> (B, N, rows_pad, 128) ---
    rows = pl.cdiv(HW, _LANES)
    ts = min(_MAX_ROWS_PER_BLOCK, _round_up(rows, 8))
    rows_pad = _round_up(rows, ts)
    hw_pad = rows_pad * _LANES

    x = attention.reshape(B, N, HW)
    if hw_pad != HW:
        x = jnp.pad(x, ((0, 0), (0, 0), (0, hw_pad - HW)))
    x = x.reshape(B, N, rows_pad, _LANES)

    grid = (B, rows_pad // ts)

    out = pl.pallas_call(
        _or_max_kernel,
        out_shape=jax.ShapeDtypeStruct((B, rows_pad, _LANES), attention.dtype),
        grid_spec=pltpu.PrefetchScalarGridSpec(
            num_scalar_prefetch=0,
            grid=grid,
            in_specs=[
                pl.BlockSpec(
                    (pl.Squeezed(), N, ts, _LANES),
                    lambda b, t: (b, 0, t, 0),
                ),
            ],
            out_specs=pl.BlockSpec(
                (pl.Squeezed(), ts, _LANES),
                lambda b, t: (b, t, 0),
            ),
        ),
        compiler_params=pltpu.CompilerParams(
            dimension_semantics=("parallel", "parallel"),
            vmem_limit_bytes=48 << 20,
        ),
    )(x)

    # undo the lane-dense retile and drop the pad region
    return out.reshape(B, hw_pad)[:, :HW].reshape(B, H, W)


if __name__ == "__main__":
    key = jax.random.PRNGKey(0)
    B, N, H, W = 2, 2, 16, 16  # num_attention_maps = 2
    attention = jax.random.normal(key, (B, N, H, W), dtype=jnp.float32)

    out = or_forward(attention)
    out = jax.block_until_ready(out)

    # correctness check vs plain JAX reference (torch.max(x, dim=1)[0])
    ref = jnp.max(attention, axis=1)
    assert out.shape == (B, H, W)
    assert jnp.allclose(out, ref), "mismatch vs reference"

    print("KERNEL_OK")
</pallas_src>

<mosaic_0001>
module attributes {stable_mosaic.version = 11 : i64} {
  func.func @_or_max_kernel(%arg0: i32, %arg1: i32, %arg2: memref<1x2x8x128xf32, #tpu.memory_space<vmem>>, %arg3: memref<1x8x128xf32, #tpu.memory_space<vmem>>) attributes {dimension_semantics = [#tpu.dimension_semantics<parallel>, #tpu.dimension_semantics<parallel>], iteration_bounds = array<i64: 2, 1>, scalar_prefetch = 0 : i64, scratch_operands = 0 : i64, tpu.core_type = #tpu.core_type<tc>, window_params = [{transform_indices = @transform_0, window_bounds = array<i64: 1, 2, 8, 128>}, {transform_indices = @transform_1, window_bounds = array<i64: 1, 8, 128>}]} {
    %c0 = arith.constant 0 : index
    %c0_0 = arith.constant 0 : index
    %c0_1 = arith.constant 0 : index
    %c0_2 = arith.constant 0 : index
    %0 = vector.load %arg2[%c0, %c0_0, %c0_1, %c0_2] : memref<1x2x8x128xf32, #tpu.memory_space<vmem>>, vector<1x1x8x128xf32>
    %1 = vector.shape_cast %0 : vector<1x1x8x128xf32> to vector<8x128xf32>
    %c0_3 = arith.constant 0 : index
    %c1 = arith.constant 1 : index
    %c0_4 = arith.constant 0 : index
    %c0_5 = arith.constant 0 : index
    %2 = vector.load %arg2[%c0_3, %c1, %c0_4, %c0_5] : memref<1x2x8x128xf32, #tpu.memory_space<vmem>>, vector<1x1x8x128xf32>
    %3 = vector.shape_cast %2 : vector<1x1x8x128xf32> to vector<8x128xf32>
    %4 = arith.maximumf %1, %3 : vector<8x128xf32>
    %c0_6 = arith.constant 0 : index
    %c0_7 = arith.constant 0 : index
    %c0_8 = arith.constant 0 : index
    %5 = vector.load %arg3[%c0_6, %c0_7, %c0_8] : memref<1x8x128xf32, #tpu.memory_space<vmem>>, vector<1x8x128xf32>
    %6 = vector.shape_cast %5 : vector<1x8x128xf32> to vector<8x128xf32>
    %7 = vector.shape_cast %4 : vector<8x128xf32> to vector<1x8x128xf32>
    tpu.vector_store %arg3[%c0_6, %c0_7, %c0_8], %7 {strides = array<i32>} : memref<1x8x128xf32, #tpu.memory_space<vmem>>, vector<1x8x128xf32>,
    return
  }
  func.func @transform_0(%arg0: i32, %arg1: i32) -> (i32, i32, i32, i32) {
    %c0_i32 = arith.constant 0 : i32
    %c0_i32_0 = arith.constant 0 : i32
    %c0_i32_1 = arith.constant 0 : i32
    return %arg0, %c0_i32, %arg1, %c0_i32_0 : i32, i32, i32, i32
  }
  func.func @transform_1(%arg0: i32, %arg1: i32) -> (i32, i32, i32) {
    %c0_i32 = arith.constant 0 : i32
    %c0_i32_0 = arith.constant 0 : i32
    return %arg0, %arg1, %c0_i32 : i32, i32, i32
  }
}

</mosaic_0001>

<bundles_post_ra>
// kernel: tpu_custom_call.1
= control target key start
LH: loop header
LB: loop body
LE: loop exit
PB: predicated region body
PF: predicated region fallthrough
CT: control target
= control target key end

     0   :  { %6 = vsyncpa [#allocation3], 0  ;;  %s584_s0 = inlined_call_operand.hbm [shape: f32[2,2,8,128], index: 0, kind: input, shape index: {}]   ;;  %s585_s1 = inlined_call_operand.hbm [shape: f32[2,8,128], index: 1, kind: output, shape index: {}]  }
   0x1   :  { %8 = vsyncpa [#allocation3 + $0x1], 0 }
   0x2   :  { %9 = vsyncpa [#allocation4], 0 }
   0x3   :  { %11 = vsyncpa [#allocation4 + $0x1], 0  ;;  %s463_s6 = smov 0   ;;  %s465_s7 = smov 0  }
   0x4   :  { %s467_s8 = smov 0   ;;  %s469_s9 = smov 0  }
   0x5   :  { %s471_s10 = smov 0   ;;  %s473_s11 = smov 0  }
   0x6 LB: > { %s257_s12 = sadd.s32 4294967295, %s449_s11   ;;  %s258_s13 = sadd.s32 4294967294, %s449_s11   ;;  %s449_s11 = sphi %s473_s11, %s17_s11   ;;  %s445_s10 = sphi %s471_s10, %s594_s10   ;;  %s441_s9 = sphi %s469_s9, %s593_s9   ;;  %s437_s8 = sphi %s467_s8, %s592_s8   ;;  %s433_s7 = sphi %s465_s7, %s591_s7   ;;  %s429_s6 = sphi %s463_s6, %s590_s6  }
   0x7   : > { %s29_s14 = sadd.s32 1, %s445_s10  ;;  %s38_s15 = sadd.s32 1, %s437_s8 }
   0x8   : > { %p31_p0 = scmp.ge.s32.totalorder %s29_s14, 2  ;;  %p45_p1 = scmp.ne.s32.totalorder %s437_s8, %s433_s7 }
   0x9   : > { %p46_p2 = scmp.eq.s32.totalorder %s449_s11, 0  ;;  %p51_p3 = scmp.ne.s32.totalorder %s433_s7, %s429_s6 }
   0xa   : > { %s596_s14 = smov (%p31_p0, %s29_s14), 0  ;;  %p52_p5 = scmp.eq.s32.totalorder %s257_s12, 0 }
   0xb   : > { %p504_p4 = por %p46_p2, %p45_p1  ;;  %s33_s17 = ssub.s32 %s445_s10, %s596_s14 }
   0xc   : > { %p77_p6 = scmp.eq.s32.totalorder %s257_s12, 1  ;;  %p36_p7 = scmp.eq.s32.totalorder %s33_s17, 0 }
   0xd   : > { %p510_p8 = por %p52_p5, %p51_p3  ;;  %p83_p10 = scmp.eq.s32.totalorder %s258_s13, 1 }
   0xe   : > { %p514_p9 = por %p77_p6, %p45_p1  ;;  %p260_p12 = scmp.ge.s32.totalorder %s449_s11, 2 }
   0xf   : > { %s519_s20 = scalar_select %p36_p7, %s437_s8, %s38_s15  }
  0x10   : > { %p521_p11 = por %p83_p10, %p51_p3  ;;  %p285_p13 = scmp.lt.s32.totalorder %s449_s11, 2 }
  0x11   : > { %s103_s22 = sand.u32 1, %s437_s8   ;;  %s272_s24 = sshll.u32 %s445_s10, 4 }
  0x12   : > { %s261_s23 = sshll.u32 %s103_s22, 4  ;;  %s113_s27 = scalar_lea.hbm %s584_s0, %s272_s24 }
  0x13   : > { %s107_s28 = scalar_lea.vmem [#allocation2], %s261_s23  ;;  %s114_s30 = sshll.u32 %s113_s27, 4  ;;  %s115_s30 = int_to_ptr.hbm [resolvable:$true] %s114_s30 }
  0x14   : > { %s116_s29 = sshll.u32 %s107_s28, 4  ;;  %p278_p0 = pnand %p285_p13, %p504_p4  ;;  %s117_s29 = int_to_ptr.vmem [resolvable:$true] %s116_s29 }
  0x15   : > { %p264_p1 = scmp.ge.s32.totalorder %s449_s11, 1  ;;  %s104_s2 = scalar_lea.sflag [#allocation3], %s103_s22 }
  0x16   : > { %s451_s3 = smov 128   ;;  %s452_s4 = smov 8  }
  0x17   : > { %280 = dma.hbm_to_vmem [thread:$0]  (!%p278_p0), %s115_s30, 256, %s117_s29, %s104_s2, %s451_s3, %s451_s3, %s452_s4  }
  0x18   : > { %p124_p2 = scmp.lt.s32.totalorder %s449_s11, 3 }
  0x1a   : > { %p125_p3 = pnand %p264_p1, %p124_p2 }
  0x1b   : > { %s537_s5 = sand.u32 (!%p125_p3), 1, %s433_s7  }
  0x1c   : > { %128 = sbr.rel (%p125_p3) target bundleno = 49 (0x31), region = 24  ;;  %s265_s12 = sshll.u32 (!%p125_p3), %s537_s5, 4 }
  0x1d   : > { %s131_s13 = scalar_lea.sflag (!%p125_p3), [#allocation3], %s537_s5  ;;  %s134_s15 = scalar_lea.vmem (!%p125_p3), [#allocation2], %s265_s12 }
  0x21   : > { %420 = dma.done.wait (%p510_p8), %s131_s13, 256  }
  0x22   : > { %422 = vsyncadd (%p510_p8), %s131_s13, 4294967040  ;;  %s266_s16 = sshll.u32 %s537_s5, 3  ;;  %s269_s17 = sshll.u32 %s441_s9, 3  ;;  %v154_v0 = vld [vmem:[%s134_s15] sm:$0xff]  ;;  %v267_v1 = vld [vmem:[%s134_s15 + $0x8] sm:$0xff] }
  0x23   : > { %s171_s24 = scalar_lea.hbm %s585_s1, %s269_s17  ;;  %s153_s25 = scalar_lea.vmem [#allocation5], %s266_s16  ;;  %v157_v2 = vmax.f32 %v154_v0, %v267_v1 }
  0x24   : > { %s173_s26 = sshll.u32 %s153_s25, 4  ;;  %s175_s27 = sshll.u32 %s171_s24, 4  ;;  %s174_s26 = int_to_ptr.vmem [resolvable:$true] %s173_s26  ;;  %s176_s27 = int_to_ptr.hbm [resolvable:$true] %s175_s27 }
  0x25   : > { %158 = vst [vmem:[%s153_s25] sm:$0xff] %v157_v2  ;;  %s160_s18 = scalar_lea.sflag [#allocation4], %s537_s5  ;;  %s381_s28 = sshra.s32 %s176_s27, 4  ;;  %s382_s28 = int_to_ptr.hbm [resolvable:$true] %s381_s28 }
  0x26   : > { %s383_s29 = scalar_lea.hbm %s382_s28, 8  ;;  %s387_s2 = scalar_lea.hbm %s585_s1, 16 }
  0x27   : > { %p384_p4 = scmp.ne.s32.totalorder %s382_s28, %s383_s29  ;;  %p388_p7 = scmp.lt.s32.totalorder %s382_s28, %s585_s1 }
  0x28   : > { %p389_p8 = scmp.lt.s32.totalorder %s387_s2, %s383_s29 }
  0x29   : > { %p385_p5 = pnand %p384_p4, %p514_p9 }
  0x2a   : > { %p390_p10 = por %p389_p8, %p388_p7 }
  0x2b   : > { %p386_p6 = pneg %p385_p5 }
  0x2d   : > { %p391_p13 = pnand %p390_p10, %p386_p6 }
  0x2f   : > { %394 = shalt.err (!%p391_p13)
}
  0x30   : > { %275 = dma.vmem_to_hbm [thread:$0]  (%p514_p9), %s174_s26, 128, %s176_s27, %s160_s18  }
  0x31 PF: > { %s187_s5 = sand.u32 1, %s429_s6   ;;  %p282_p0 = pnand %p260_p12, %p521_p11 }
  0x32   : > { %s188_s12 = scalar_lea.sflag [#allocation4], %s187_s5 }
  0x33   : > { %p283_p1 = pneg %p282_p0 }
  0x35   : > { %424 = dma.done.wait (%p283_p1), %s188_s12, 128  }
  0x36   : > { %426 = vsyncadd (%p283_p1), %s188_s12, 4294967168  ;;  %s17_s11 = sadd.s32 1, %s449_s11   ;;  %s590_s6 = smov %s433_s7 }
  0x37   : > { %p14_p2 = scmp.ge.s32.totalorder %s17_s11, 4   ;;  %s591_s7 = smov %s437_s8 }
  0x38   : > { %s592_s8 = smov %s519_s20  ;;  %s593_s9 = smov %s445_s10 }
  0x39   : > { %s594_s10 = smov %s596_s14  ;;  %16 = sbr.rel (!%p14_p2) target bundleno = 6 (0x6), region = 70 }
  0x3e   :  { %194 = vsyncpa [#allocation3], 1 }
  0x3f   :  { %196 = vsyncpa [#allocation3 + $0x1], 1 }
  0x40   :  { %197 = vsyncpa [#allocation4], 1 }
  0x41   :  { %199 = vsyncpa [#allocation4 + $0x1], 1 }

</bundles_post_ra>
